<compile_context>
chip_gen: v5e
topology: v5e:2x2
jax: 0.10.0
libtpu: 0.0.40
codegen_flags: <defaults>
</compile_context>

<pallas_src>
import math

import jax
import jax.numpy as jnp
from jax import lax
from jax.experimental import pallas as pl
from jax.experimental.pallas import tpu as pltpu

# Small synthetic shapes consistent with the module (hidden = 4 * dim).
DIM = 128        # embedding dim   (module default 768)
HIDDEN = 512     # MLP hidden dim  (module default 3072 = 4 * dim)
NX = 4           # rows of x
NQ = 8           # rows of query   (NQ % NX == 0, as the module assumes)

_INV_SQRT2 = 1.0 / math.sqrt(2.0)


def _gelu_exact(h):
    # Exact-erf GELU (PyTorch nn.GELU default), evaluated in f32.
    return 0.5 * h * (1.0 + lax.erf(h * _INV_SQRT2))


def _mlp_kernel_resident(inp_ref, w1_ref, b1_ref, w2_ref, b2_ref, o_ref):
    """One row tile of GELU(inp@W1 + b1) @ W2 + b2 with W1/W2 VMEM-resident.

    inp/W1/W2 are bf16 (MXU-native), accumulation and bias/GELU in f32.
    """
    h = jnp.dot(inp_ref[...], w1_ref[...], preferred_element_type=jnp.float32)
    h = _gelu_exact(h + b1_ref[...])
    out = jnp.dot(h.astype(w2_ref.dtype), w2_ref[...],
                  preferred_element_type=jnp.float32)
    # Dropout(p=0.1): identity in deterministic / eval forward.
    o_ref[...] = (out + b2_ref[...]).astype(o_ref.dtype)


def _mlp_kernel_hidden_tiled(inp_ref, w1_ref, b1_ref, w2_ref, b2_ref, o_ref):
    """Fallback when W1/W2 are too large to sit resident in VMEM.

    Streams weight chunks over a trailing hidden (reduction) grid axis and
    accumulates directly into o_ref (block index constant across that axis).
    """
    h_idx = pl.program_id(1)

    @pl.when(h_idx == 0)
    def _():
        o_ref[...] = jnp.broadcast_to(b2_ref[...], o_ref.shape).astype(o_ref.dtype)

    h = jnp.dot(inp_ref[...], w1_ref[...], preferred_element_type=jnp.float32)
    h = _gelu_exact(h + b1_ref[...])
    o_ref[...] += jnp.dot(h.astype(w2_ref.dtype), w2_ref[...],
                          preferred_element_type=jnp.float32)


def _round_up(a, b):
    return -(-a // b) * b


def _vmem_capacity_bytes():
    try:
        return int(pltpu.get_tpu_info().vmem_capacity_bytes)
    except Exception:
        return 64 * 1024 * 1024          # conservative (v7x-sized) fallback


def mlp_decoder_forward(x, query, params):
    """x: (NX, dim), query: (NQ, dim) -> (NX*rep + NQ, dim) float32."""
    rep = query.shape[0] // x.shape[0]
    # torch.Tensor.repeat(rep, 1) tiles the whole tensor == jnp.tile.
    inp = jnp.concatenate([jnp.tile(x, (rep, 1)), query], axis=0)
    M, dim = inp.shape

    w1, b1, w2, b2 = params["w1"], params["b1"], params["w2"], params["b2"]
    hidden = w1.shape[1]

    # bf16 matmul operands; biases stay f32 (added to the f32 accumulators).
    inp_bf = inp.astype(jnp.bfloat16)
    w1_bf = w1.astype(jnp.bfloat16)
    w2_bf = w2.astype(jnp.bfloat16)

    # ---- Row tiling: >=2 row tiles whenever M >= 16 (v7x megacore). -------
    TM_MAX = 512
    M8 = _round_up(M, 8)
    if M8 >= 16:
        n_tiles = max(2, pl.cdiv(M8, TM_MAX))
        TM = _round_up(pl.cdiv(M8, n_tiles), 8)
        n_tiles = pl.cdiv(M8, TM)
    else:
        TM, n_tiles = M8, 1
    M_pad = TM * n_tiles
    if M_pad != M:
        # TODO(synk): a masked-store tail tile would avoid this HBM round-trip;
        # pad is at most TM-1 rows because TM is chosen to divide M_pad.
        inp_bf = jnp.pad(inp_bf, ((0, M_pad - M), (0, 0)))

    # ---- VMEM budget: never claim the full physical VMEM (esp. v7x). ------
    vmem_cap = _vmem_capacity_bytes()
    vmem_limit = (vmem_cap * 3) // 4          # ~48 MiB v7x, ~96 MiB v5e/v6e

    resident_bytes = 2 * dim * hidden * 2                     # W1 + W2, bf16
    per_tile_bytes = (2 * TM * dim * 2        # inp, double-buffered, bf16
                      + 2 * TM * dim * 4      # out, double-buffered, f32
                      + TM * hidden * 4       # f32 hidden activations
                      + (hidden + dim) * 4)   # biases
    use_resident = resident_bytes + per_tile_bytes < (vmem_limit * 3) // 4

    if use_resident:
        # Weights fully resident; grid over row tiles only -> compute-bound,
        # no reduction machinery, no re-streaming of weights per row tile.
        out = pl.pallas_call(
            _mlp_kernel_resident,
            out_shape=jax.ShapeDtypeStruct((M_pad, dim), jnp.float32),
            grid_spec=pltpu.PrefetchScalarGridSpec(
                num_scalar_prefetch=0,
                grid=(n_tiles,),
                in_specs=[
                    pl.BlockSpec((TM, dim), lambda i: (i, 0)),       # activations
                    pl.BlockSpec((dim, hidden), lambda i: (0, 0)),   # W1 (resident)
                    pl.BlockSpec((1, hidden), lambda i: (0, 0)),     # b1
                    pl.BlockSpec((hidden, dim), lambda i: (0, 0)),   # W2 (resident)
                    pl.BlockSpec((1, dim), lambda i: (0, 0)),        # b2
                ],
                out_specs=pl.BlockSpec((TM, dim), lambda i: (i, 0)),
            ),
            compiler_params=pltpu.CompilerParams(
                dimension_semantics=("parallel",),
                vmem_limit_bytes=vmem_limit,
            ),
        )(inp_bf, w1_bf, b1, w2_bf, b2)
    else:
        # Stream weights over a trailing hidden (reduction) axis; o_ref's block
        # index is constant across it, so it serves as the accumulator.
        TH = hidden
        for cand in (2048, 1536, 1024, 512):
            if hidden > cand and hidden % cand == 0:
                TH = cand
                break
        out = pl.pallas_call(
            _mlp_kernel_hidden_tiled,
            out_shape=jax.ShapeDtypeStruct((M_pad, dim), jnp.float32),
            grid_spec=pltpu.PrefetchScalarGridSpec(
                num_scalar_prefetch=0,
                grid=(n_tiles, hidden // TH),
                in_specs=[
                    pl.BlockSpec((TM, dim), lambda i, h: (i, 0)),
                    pl.BlockSpec((dim, TH), lambda i, h: (0, h),
                                 pipeline_mode=pl.Buffered(3)),       # W1 chunks
                    pl.BlockSpec((1, TH), lambda i, h: (0, h)),       # b1 chunk
                    pl.BlockSpec((TH, dim), lambda i, h: (h, 0),
                                 pipeline_mode=pl.Buffered(3)),       # W2 chunks
                    pl.BlockSpec((1, dim), lambda i, h: (0, 0)),      # b2
                ],
                out_specs=pl.BlockSpec((TM, dim), lambda i, h: (i, 0)),
            ),
            compiler_params=pltpu.CompilerParams(
                dimension_semantics=("parallel", "arbitrary"),
                vmem_limit_bytes=vmem_limit,
            ),
        )(inp_bf, w1_bf, b1, w2_bf, b2)

    return out[:M]


def init_params(key):
    ks = jax.random.split(key, 4)
    std = 0.02

    def n(k, shape, s=std):
        return (s * jax.random.normal(k, shape)).astype(jnp.float32)

    # nn.Linear stores (out, in); pre-transpose to (in, out) for the kernel.
    w1 = n(ks[0], (HIDDEN, DIM)).T            # (DIM, HIDDEN)
    b1 = n(ks[1], (HIDDEN,)).reshape(1, HIDDEN)
    w2 = n(ks[2], (DIM, HIDDEN)).T            # (HIDDEN, DIM)
    b2 = n(ks[3], (DIM,)).reshape(1, DIM)
    return dict(w1=w1, b1=b1, w2=w2, b2=b2)


def mlp_decoder_reference(x, query, p):
    """Pure-JAX f32 mirror of the PyTorch forward (eval mode, dropout = id)."""
    rep = query.shape[0] // x.shape[0]
    inp = jnp.concatenate([jnp.tile(x, (rep, 1)), query], axis=0)
    h = _gelu_exact(inp @ p["w1"] + p["b1"][0])
    return h @ p["w2"] + p["b2"][0]


if __name__ == "__main__":
    key = jax.random.PRNGKey(0)
    k_x, k_q, k_p = jax.random.split(key, 3)
    x = jax.random.normal(k_x, (NX, DIM), dtype=jnp.float32)
    query = jax.random.normal(k_q, (NQ, DIM), dtype=jnp.float32)
    params = init_params(k_p)

    out = mlp_decoder_forward(x, query, params)
    out = jax.block_until_ready(out)

    ref = mlp_decoder_reference(x, query, params)
    assert out.shape == (NX * (NQ // NX) + NQ, DIM), out.shape
    # bf16 matmul operands -> loosened tolerance vs. the f32 reference.
    max_err = float(jnp.max(jnp.abs(out - ref)))
    assert jnp.allclose(out, ref, atol=2e-2, rtol=5e-2), max_err
    print("KERNEL_OK")
</pallas_src>

<mosaic_0001>
module attributes {stable_mosaic.version = 11 : i64} {
  func.func @_mlp_kernel_resident(%arg0: i32, %arg1: memref<8x128xbf16, #tpu.memory_space<vmem>>, %arg2: memref<128x512xbf16, #tpu.memory_space<vmem>>, %arg3: memref<1x512xf32, #tpu.memory_space<vmem>>, %arg4: memref<512x128xbf16, #tpu.memory_space<vmem>>, %arg5: memref<1x128xf32, #tpu.memory_space<vmem>>, %arg6: memref<8x128xf32, #tpu.memory_space<vmem>>) attributes {dimension_semantics = [#tpu.dimension_semantics<parallel>], iteration_bounds = array<i64: 2>, scalar_prefetch = 0 : i64, scratch_operands = 0 : i64, tpu.core_type = #tpu.core_type<tc>, window_params = [{transform_indices = @transform_0, window_bounds = array<i64: 8, 128>}, {pipeline_mode = #tpu.pipeline_mode<synchronous>, transform_indices = @transform_1, window_bounds = array<i64: 128, 512>}, {pipeline_mode = #tpu.pipeline_mode<synchronous>, transform_indices = @transform_2, window_bounds = array<i64: 1, 512>}, {pipeline_mode = #tpu.pipeline_mode<synchronous>, transform_indices = @transform_3, window_bounds = array<i64: 512, 128>}, {pipeline_mode = #tpu.pipeline_mode<synchronous>, transform_indices = @transform_4, window_bounds = array<i64: 1, 128>}, {transform_indices = @transform_5, window_bounds = array<i64: 8, 128>}]} {
    %c0 = arith.constant 0 : index
    %c0_0 = arith.constant 0 : index
    %0 = vector.load %arg1[%c0, %c0_0] : memref<8x128xbf16, #tpu.memory_space<vmem>>, vector<8x128xbf16>
    %c0_1 = arith.constant 0 : index
    %c0_2 = arith.constant 0 : index
    %1 = vector.load %arg2[%c0_1, %c0_2] : memref<128x512xbf16, #tpu.memory_space<vmem>>, vector<128x512xbf16>
    %cst = arith.constant dense<0.000000e+00> : vector<8x512xf32>
    %2 = tpu.matmul %0, %1, %cst {dimension_numbers = #tpu.dot_dimension_numbers<[1], [0], [0], [1], [0, 0, 1, 1], [], []>} : vector<8x128xbf16>, vector<128x512xbf16>, vector<8x512xf32> -> vector<8x512xf32>
    %c0_3 = arith.constant 0 : index
    %c0_4 = arith.constant 0 : index
    %3 = vector.load %arg3[%c0_3, %c0_4] : memref<1x512xf32, #tpu.memory_space<vmem>>, vector<1x512xf32>
    %4 = vector.broadcast %3 : vector<1x512xf32> to vector<8x512xf32>
    %5 = arith.addf %2, %4 : vector<8x512xf32>
    %cst_5 = arith.constant 5.000000e-01 : f32
    %6 = vector.broadcast %cst_5 : f32 to vector<8x512xf32>
    %7 = arith.mulf %6, %5 : vector<8x512xf32>
    %cst_6 = arith.constant 0.707106769 : f32
    %8 = vector.broadcast %cst_6 : f32 to vector<8x512xf32>
    %9 = arith.mulf %5, %8 : vector<8x512xf32>
    %10 = math.erf %9 : vector<8x512xf32>
    %cst_7 = arith.constant 1.000000e+00 : f32
    %11 = vector.broadcast %cst_7 : f32 to vector<8x512xf32>
    %12 = arith.addf %11, %10 : vector<8x512xf32>
    %13 = arith.mulf %7, %12 : vector<8x512xf32>
    %14 = arith.truncf %13 : vector<8x512xf32> to vector<8x512xbf16>
    %c0_8 = arith.constant 0 : index
    %c0_9 = arith.constant 0 : index
    %15 = vector.load %arg4[%c0_8, %c0_9] : memref<512x128xbf16, #tpu.memory_space<vmem>>, vector<512x128xbf16>
    %cst_10 = arith.constant dense<0.000000e+00> : vector<8x128xf32>
    %16 = tpu.matmul %14, %15, %cst_10 {dimension_numbers = #tpu.dot_dimension_numbers<[1], [0], [0], [1], [0, 0, 1, 1], [], []>} : vector<8x512xbf16>, vector<512x128xbf16>, vector<8x128xf32> -> vector<8x128xf32>
    %c0_11 = arith.constant 0 : index
    %c0_12 = arith.constant 0 : index
    %17 = vector.load %arg5[%c0_11, %c0_12] : memref<1x128xf32, #tpu.memory_space<vmem>>, vector<1x128xf32>
    %18 = vector.broadcast %17 : vector<1x128xf32> to vector<8x128xf32>
    %19 = arith.addf %16, %18 : vector<8x128xf32>
    %c0_13 = arith.constant 0 : index
    %c0_14 = arith.constant 0 : index
    %20 = vector.load %arg6[%c0_13, %c0_14] : memref<8x128xf32, #tpu.memory_space<vmem>>, vector<8x128xf32>
    tpu.vector_store %arg6[%c0_13, %c0_14], %19 {strides = array<i32>} : memref<8x128xf32, #tpu.memory_space<vmem>>, vector<8x128xf32>,
    return
  }
  func.func @transform_0(%arg0: i32) -> (i32, i32) {
    %c0_i32 = arith.constant 0 : i32
    %c0_i32_0 = arith.constant 0 : i32
    return %arg0, %c0_i32 : i32, i32
  }
  func.func @transform_1(%arg0: i32) -> (i32, i32) {
    %c0_i32 = arith.constant 0 : i32
    %c0_i32_0 = arith.constant 0 : i32
    %c0_i32_1 = arith.constant 0 : i32
    return %c0_i32, %c0_i32_0 : i32, i32
  }
  func.func @transform_2(%arg0: i32) -> (i32, i32) {
    %c0_i32 = arith.constant 0 : i32
    %c0_i32_0 = arith.constant 0 : i32
    %c0_i32_1 = arith.constant 0 : i32
    return %c0_i32, %c0_i32_0 : i32, i32
  }
  func.func @transform_3(%arg0: i32) -> (i32, i32) {
    %c0_i32 = arith.constant 0 : i32
    %c0_i32_0 = arith.constant 0 : i32
    %c0_i32_1 = arith.constant 0 : i32
    return %c0_i32, %c0_i32_0 : i32, i32
  }
  func.func @transform_4(%arg0: i32) -> (i32, i32) {
    %c0_i32 = arith.constant 0 : i32
    %c0_i32_0 = arith.constant 0 : i32
    %c0_i32_1 = arith.constant 0 : i32
    return %c0_i32, %c0_i32_0 : i32, i32
  }
  func.func @transform_5(%arg0: i32) -> (i32, i32) {
    %c0_i32 = arith.constant 0 : i32
    %c0_i32_0 = arith.constant 0 : i32
    return %arg0, %c0_i32 : i32, i32
  }
}

</mosaic_0001>

<bundles_post_ra>
// kernel: tpu_custom_call.1
= control target key start
LH: loop header
LB: loop body
LE: loop exit
PB: predicated region body
PF: predicated region fallthrough
CT: control target
= control target key end

     0   :  { %10 = vsyncpa [#allocation3], 0  ;;  %s2087_s0 = inlined_call_operand.hbm [shape: bf16[16,128], index: 0, kind: input, shape index: {}]   ;;  %s2088_s1 = inlined_call_operand.hbm [shape: bf16[128,512], index: 1, kind: input, shape index: {}]   ;;  %s2089_s2 = inlined_call_operand.hbm [shape: f32[1,512], index: 2, kind: input, shape index: {}]   ;;  %s2090_s3 = inlined_call_operand.hbm [shape: bf16[512,128], index: 3, kind: input, shape index: {}]   ;;  %s2091_s4 = inlined_call_operand.vmem [shape: f32[1,128], index: 4, kind: input, shape index: {}]   ;;  %s2092_s5 = inlined_call_operand.hbm [shape: f32[16,128], index: 5, kind: output, shape index: {}]  }
   0x1   :  { %12 = vsyncpa [#allocation3 + $0x1], 0 }
   0x2   :  { %13 = vsyncpa [#allocation6], 0 }
   0x3   :  { %14 = vsyncpa [#allocation9], 0 }
   0x4   :  { %15 = vsyncpa [#allocation4], 0 }
   0x5   :  { %17 = vsyncpa [#allocation4 + $0x1], 0  ;;  %s1818_s18 = smov 0   ;;  %s1820_s19 = smov 0  }
   0x6   :  { %s1822_s20 = smov 0   ;;  %s1824_s21 = smov 0  }
   0x7 LB: > { %s175_s24 = sshll.u32 %s2088_s1, 4  ;;  %s1842_s25 = sadd.s32 4294967295, %s1779_s21   ;;  %s1779_s21 = sphi %s1824_s21, %s2103_s21   ;;  %s1775_s20 = sphi %s1822_s20, %s2102_s20   ;;  %s1771_s19 = sphi %s1820_s19, %s2101_s19   ;;  %s1767_s18 = sphi %s1818_s18, %s2100_s18   ;;  %s176_s24 = int_to_ptr.hbm [resolvable:$true] %s175_s24 }
   0x8   : > { %p1154_p0 = scmp.ge.s32.totalorder %s1779_s21, 1  ;;  %p44_p1 = scmp.eq.s32.totalorder %s1842_s25, 0 }
   0x9   : > { %p164_p2 = scmp.lt.s32.totalorder %s1779_s21, 3  ;;  %s1781_s27 = smov [#allocation5]  }
   0xa   : > { %s177_s28 = sshll.u32 %s1781_s27, 4  ;;  %s190_s6 = sshll.u32 %s2089_s2, 4  ;;  %s178_s28 = int_to_ptr.vmem [resolvable:$true] %s177_s28  ;;  %s191_s6 = int_to_ptr.hbm [resolvable:$true] %s190_s6 }
   0xb   : > { %p1847_p3 = pnand %p1154_p0, %p164_p2  ;;  %s201_s10 = sshll.u32 %s2090_s3, 4  ;;  %s202_s10 = int_to_ptr.hbm [resolvable:$true] %s201_s10 }
   0xc   : > { %s1782_s11 = smov [#allocation7]   ;;  %s1783_s13 = smov 256  }
   0xd   : > { %p1511_p4 = pneg %p1847_p3  ;;  %s192_s12 = sshll.u32 %s1782_s11, 4  ;;  %s193_s12 = int_to_ptr.vmem [resolvable:$true] %s192_s12 }
   0xe   : > { %s1784_s14 = smov 16   ;;  %s1785_s15 = smov [#allocation8]  }
   0xf   : > { %p1859_p6 = pnand %p1511_p4, %p44_p1  ;;  %s203_s16 = sshll.u32 %s1785_s15, 4  ;;  %s204_s16 = int_to_ptr.vmem [resolvable:$true] %s203_s16 }
  0x10   : > { %s1786_s17 = smov 64   ;;  %s1787_s22 = smov 4  }
  0x11   : > { %1514 = dma.hbm_to_vmem [thread:$0]  (!%p1859_p6), %s176_s24, 4096, %s178_s28, [#allocation6], %s1783_s13, %s1783_s13, %s1784_s14  }
  0x12   : > { %1517 = dma.hbm_to_vmem [thread:$0]  (!%p1859_p6), %s191_s6, 64, %s193_s12, [#allocation6]  }
  0x13   : > { %1520 = dma.hbm_to_vmem [thread:$0]  (!%p1859_p6), %s202_s10, 4096, %s204_s16, [#allocation9], %s1786_s17, %s1786_s17, %s1787_s22  }
  0x14   : > { %s1153_s23 = sadd.s32 4294967294, %s1779_s21   ;;  %s1874_s24 = sadd.s32 1, %s1779_s21  }
  0x15   : > { %s30_s27 = sadd.s32 1, %s1775_s20  ;;  %s27_s28 = ssub.s32 %s1779_s21, %s1874_s24 }
  0x16   : > { %p37_p7 = scmp.ne.s32.totalorder %s1775_s20, %s1771_s19  ;;  %p28_p8 = scmp.eq.s32.totalorder %s27_s28, 0 }
  0x17   : > { %p38_p9 = scmp.eq.s32.totalorder %s1779_s21, 0  ;;  %p43_p10 = scmp.ne.s32.totalorder %s1771_s19, %s1767_s18 }
  0x18   : > { %p151_p11 = scmp.eq.s32.totalorder %s1842_s25, 1  ;;  %p157_p0 = scmp.eq.s32.totalorder %s1153_s23, 1 }
  0x19   : > { %s1886_s29 = scalar_select %p28_p8, %s1775_s20, %s30_s27  }
  0x1a   : > { %p1890_p12 = por %p44_p1, %p43_p10  ;;  %p1894_p13 = por %p151_p11, %p37_p7 }
  0x1b   : > { %p39_p2 = por %p38_p9, %p37_p7  ;;  %s220_s7 = sand.u32 1, %s1775_s20  }
  0x1c   : > { %p1899_p4 = por %p157_p0, %p43_p10  ;;  %p1532_p6 = scmp.lt.s32.totalorder %s1779_s21, 2 }
  0x1d   : > { %s1159_s9 = sshll.u32 %s220_s7, 2  ;;  %s1160_s10 = sshll.u32 %s1779_s21, 2 }
  0x1e   : > { %s228_s13 = scalar_lea.hbm %s2087_s0, %s1160_s10  ;;  %s224_s15 = scalar_lea.vmem [#allocation2], %s1159_s9 }
  0x1f   : > { %s230_s14 = sshll.u32 %s228_s13, 4  ;;  %s232_s16 = sshll.u32 %s224_s15, 4  ;;  %s231_s14 = int_to_ptr.hbm [resolvable:$true] %s230_s14  ;;  %s233_s16 = int_to_ptr.vmem [resolvable:$true] %s232_s16 }
  0x20   : > { %p1908_p8 = pnand %p1532_p6, %p39_p2  ;;  %s221_s22 = scalar_lea.sflag [#allocation3], %s220_s7 }
  0x21   : > { %s1675_s23 = sshra.s32 %s231_s14, 4  ;;  %s1682_s9 = scalar_lea.hbm %s2087_s0, 8  ;;  %s1676_s23 = int_to_ptr.hbm [resolvable:$true] %s1675_s23 }
  0x22   : > { %s1677_s27 = scalar_lea.hbm %s1676_s23, 4  ;;  %p1679_p9 = pneg %p1908_p8 }
  0x23   : > { %p1678_p7 = scmp.ne.s32.totalorder %s1676_s23, %s1677_s27  ;;  %p1683_p0 = scmp.lt.s32.totalorder %s1676_s23, %s2087_s0 }
  0x24   : > { %p1684_p2 = scmp.lt.s32.totalorder %s1682_s9, %s1677_s27 }
  0x25   : > { %p1680_p10 = pnand %p1679_p9, %p1678_p7 }
  0x26   : > { %p1685_p6 = por %p1684_p2, %p1683_p0 }
  0x27   : > { %p1681_p11 = pneg %p1680_p10 }
  0x29   : > { %p1686_p5 = pnand %p1685_p6, %p1681_p11 }
  0x2b   : > { %1689 = shalt.err (!%p1686_p5)
}
  0x2c   : > { %1524 = dma.hbm_to_vmem [thread:$0]  (!%p1908_p8), %s231_s14, 64, %s233_s16, %s221_s22  }
  0x2d   : > { %241 = sbr.rel (%p1847_p3) target bundleno = 421 (0x1a5), region = 40  ;;  %s1925_s7 = sand.u32 (!%p1847_p3), 1, %s1771_s19  }
  0x2e   : > { %s1162_s13 = sshll.u32 (!%p1847_p3), %s1925_s7, 2  ;;  %s244_s15 = scalar_lea.sflag (!%p1847_p3), [#allocation3], %s1925_s7 }
  0x2f   : > { %s1929_s28 = scalar_lea.vmem (!%p1847_p3), [#allocation2], %s1162_s13 }
  0x32   : > { %1750 = dma.done.wait (%p1890_p12), %s244_s15, 64  }
  0x33   : > { %1752 = vsyncadd (%p1890_p12), %s244_s15, 4294967232 }
  0x34   : > { %1754 = dma.done.wait (%p44_p1), [#allocation6], 4160  }
  0x35   : > { %1756 = vsyncadd (%p44_p1), [#allocation6], 4294963136 }
  0x36   : > { %1758 = dma.done.wait (%p44_p1), [#allocation9], 4096  }
  0x37   : > { %1760 = vsyncadd (%p44_p1), [#allocation9], 4294963200  ;;  %v1281_v0 = vld [vmem:[#allocation5 + $0xe0] sm:$0xf]  ;;  %v1461_v1 = vld [vmem:[#allocation5 + $0xec] sm:$0xf0] }
  0x38   : > { %v1459_v2 = vld [vmem:[#allocation5 + $0xe4] sm:$0xf]  ;;  %v1282_v3 = vor.u32 %v1461_v1, %v1281_v0  ;;  %v1283_v4 = vld [vmem:[#allocation5 + $0xf0] sm:$0xf0]  ;;  %v1289_v5 = vld [vmem:[#allocation5 + $0xe8] sm:$0xf] }
  0x39   : > { %v1462_v6 = vld [vmem:[#allocation5 + $0xf4] sm:$0xf0]  ;;  %v1286_v7 = vor.u32 %v1459_v2, %v1283_v4  ;;  %v1460_v9 = vld [vmem:[#allocation5 + $0xec] sm:$0xf]  ;;  %v1291_v10 = vld [vmem:[#allocation5 + $0xf8] sm:$0xf0] }
  0x3a   : > { %v1290_v8 = vor.u32 %v1462_v6, %v1289_v5  ;;  %v1265_v11 = vld [vmem:[#allocation5 + $0xc0] sm:$0xf]  ;;  %493 = vmatpush.bf16.msra.mxu0 %v1282_v3  ;;  %v1294_v12 = vor.u32 %v1460_v9, %v1291_v10  ;;  %v1457_v13 = vld [vmem:[#allocation5 + $0xcc] sm:$0xf0]  ;;  %v1455_v14 = vld [vmem:[#allocation5 + $0xc4] sm:$0xf] }
  0x3b   : > { %v1267_v15 = vld [vmem:[#allocation5 + $0xd0] sm:$0xf0]  ;;  %506 = vmatpush.bf16.msra.mxu1 %v1286_v7  ;;  %v1266_v16 = vor.u32 %v1457_v13, %v1265_v11  ;;  %v1273_v18 = vld [vmem:[#allocation5 + $0xc8] sm:$0xf]  ;;  %v1458_v19 = vld [vmem:[#allocation5 + $0xd4] sm:$0xf0] }
  0x3c   : > { %519 = vmatpush.bf16.msra.mxu2 %v1290_v8  ;;  %v1270_v17 = vor.u32 %v1455_v14, %v1267_v15  ;;  %v1456_v20 = vld [vmem:[#allocation5 + $0xcc] sm:$0xf]  ;;  %532 = vmatpush.bf16.msra.mxu3 %v1294_v12  ;;  %v1274_v21 = vor.u32 %v1458_v19, %v1273_v18  ;;  %v1275_v22 = vld [vmem:[#allocation5 + $0xd8] sm:$0xf0]  ;;  %v1249_v23 = vld [vmem:[#allocation5 + $0xa0] sm:$0xf] }
  0x3d   : > { %v1453_v24 = vld [vmem:[#allocation5 + $0xac] sm:$0xf0]  ;;  %v1278_v25 = vor.u32 %v1456_v20, %v1275_v22  ;;  %v1451_v26 = vld [vmem:[#allocation5 + $0xa4] sm:$0xf]  ;;  %v1251_v27 = vld [vmem:[#allocation5 + $0xb0] sm:$0xf0] }
  0x3e   : > { %v1257_v28 = vld [vmem:[#allocation5 + $0xa8] sm:$0xf]  ;;  %494 = vmatpush.bf16.msra.mxu0 %v1266_v16  ;;  %v1250_v29 = vor.u32 %v1453_v24, %v1249_v23  ;;  %v1454_v30 = vld [vmem:[#allocation5 + $0xb4] sm:$0xf0]  ;;  %v1452_v31 = vld [vmem:[#allocation5 + $0xac] sm:$0xf]  ;;  %v1254_v33 = vor.u32 %v1451_v26, %v1251_v27 }
  0x3f   : > { %v1259_v32 = vld [vmem:[#allocation5 + $0xb8] sm:$0xf0]  ;;  %507 = vmatpush.bf16.msra.mxu1 %v1270_v17  ;;  %v1258_v34 = vor.u32 %v1454_v30, %v1257_v28  ;;  %v1233_v35 = vld [vmem:[#allocation5 + $0x80] sm:$0xf]  ;;  %v1449_v36 = vld [vmem:[#allocation5 + $0x8c] sm:$0xf0] }
  0x40   : > { %520 = vmatpush.bf16.msra.mxu2 %v1274_v21  ;;  %v1447_v37 = vld [vmem:[#allocation5 + $0x84] sm:$0xf]  ;;  %533 = vmatpush.bf16.msra.mxu3 %v1278_v25  ;;  %v1262_v38 = vor.u32 %v1452_v31, %v1259_v32  ;;  %v1235_v39 = vld [vmem:[#allocation5 + $0x90] sm:$0xf0]  ;;  %v1241_v40 = vld [vmem:[#allocation5 + $0x88] sm:$0xf]  ;;  %v1234_v44 = vor.u32 %v1449_v36, %v1233_v35 }
  0x41   : > { %v1450_v41 = vld [vmem:[#allocation5 + $0x94] sm:$0xf0]  ;;  %v1448_v42 = vld [vmem:[#allocation5 + $0x8c] sm:$0xf]  ;;  %v1243_v43 = vld [vmem:[#allocation5 + $0x98] sm:$0xf0]  ;;  %v1238_v45 = vor.u32 %v1447_v37, %v1235_v39 }
  0x42   : > { %495 = vmatpush.bf16.msra.mxu0 %v1250_v29  ;;  %v1242_v46 = vor.u32 %v1450_v41, %v1241_v40  ;;  %v1217_v47 = vld [vmem:[#allocation5 + $0x60] sm:$0xf]  ;;  %v1445_v48 = vld [vmem:[#allocation5 + $0x6c] sm:$0xf0]  ;;  %v1443_v49 = vld [vmem:[#allocation5 + $0x64] sm:$0xf]  ;;  %v1246_v50 = vor.u32 %v1448_v42, %v1243_v43 }
  0x43   : > { %508 = vmatpush.bf16.msra.mxu1 %v1254_v33  ;;  %v1219_v51 = vld [vmem:[#allocation5 + $0x70] sm:$0xf0]  ;;  %v1225_v52 = vld [vmem:[#allocation5 + $0x68] sm:$0xf]  ;;  %v1446_v53 = vld [vmem:[#allocation5 + $0x74] sm:$0xf0]  ;;  %v1218_v56 = vor.u32 %v1445_v48, %v1217_v47 }
  0x44   : > { %521 = vmatpush.bf16.msra.mxu2 %v1258_v34  ;;  %534 = vmatpush.bf16.msra.mxu3 %v1262_v38  ;;  %v1444_v54 = vld [vmem:[#allocation5 + $0x6c] sm:$0xf]  ;;  %v1227_v55 = vld [vmem:[#allocation5 + $0x78] sm:$0xf0]  ;;  %v1222_v57 = vor.u32 %v1443_v49, %v1219_v51  ;;  %v1226_v58 = vor.u32 %v1446_v53, %v1225_v52  ;;  %v1201_v59 = vld [vmem:[#allocation5 + $0x40] sm:$0xf] }
  0x45   : > { %v1441_v60 = vld [vmem:[#allocation5 + $0x4c] sm:$0xf0]  ;;  %v1439_v61 = vld [vmem:[#allocation5 + $0x44] sm:$0xf]  ;;  %v1230_v62 = vor.u32 %v1444_v54, %v1227_v55  ;;  %v1203_v63 = vld [vmem:[#allocation5 + $0x50] sm:$0xf0] }
  0x46   : > { %496 = vmatpush.bf16.msra.mxu0 %v1234_v44  ;;  %v1209_v0 = vld [vmem:[#allocation5 + $0x48] sm:$0xf]  ;;  %v1442_v1 = vld [vmem:[#allocation5 + $0x54] sm:$0xf0]  ;;  %v1440_v2 = vld [vmem:[#allocation5 + $0x4c] sm:$0xf]  ;;  %v1202_v4 = vor.u32 %v1441_v60, %v1201_v59  ;;  %v1206_v5 = vor.u32 %v1439_v61, %v1203_v63 }
  0x47   : > { %509 = vmatpush.bf16.msra.mxu1 %v1238_v45  ;;  %v1211_v3 = vld [vmem:[#allocation5 + $0x58] sm:$0xf0]  ;;  %v1210_v6 = vor.u32 %v1442_v1, %v1209_v0  ;;  %v1185_v7 = vld [vmem:[#allocation5 + $0x20] sm:$0xf]  ;;  %v1437_v8 = vld [vmem:[#allocation5 + $0x2c] sm:$0xf0] }
  0x48   : > { %522 = vmatpush.bf16.msra.mxu2 %v1242_v46  ;;  %535 = vmatpush.bf16.msra.mxu3 %v1246_v50  ;;  %v1435_v9 = vld [vmem:[#allocation5 + $0x24] sm:$0xf]  ;;  %v1214_v10 = vor.u32 %v1440_v2, %v1211_v3  ;;  %v1187_v11 = vld [vmem:[#allocation5 + $0x30] sm:$0xf0]  ;;  %v1193_v12 = vld [vmem:[#allocation5 + $0x28] sm:$0xf]  ;;  %v1186_v16 = vor.u32 %v1437_v8, %v1185_v7 }
  0x49   : > { %v1438_v13 = vld [vmem:[#allocation5 + $0x34] sm:$0xf0]  ;;  %v1436_v14 = vld [vmem:[#allocation5 + $0x2c] sm:$0xf]  ;;  %v1195_v15 = vld [vmem:[#allocation5 + $0x38] sm:$0xf0]  ;;  %v1190_v17 = vor.u32 %v1435_v9, %v1187_v11 }
  0x4a   : > { %497 = vmatpush.bf16.msra.mxu0 %v1218_v56  ;;  %v1194_v18 = vor.u32 %v1438_v13, %v1193_v12  ;;  %v1169_v19 = vld [vmem:[#allocation5] sm:$0xf]  ;;  %v1433_v20 = vld [vmem:[#allocation5 + $0xc] sm:$0xf0]  ;;  %v1431_v21 = vld [vmem:[#allocation5 + $0x4] sm:$0xf]  ;;  %v1198_v22 = vor.u32 %v1436_v14, %v1195_v15 }
  0x4b   : > { %510 = vmatpush.bf16.msra.mxu1 %v1222_v57  ;;  %v1171_v23 = vld [vmem:[#allocation5 + $0x10] sm:$0xf0]  ;;  %v1177_v24 = vld [vmem:[#allocation5 + $0x8] sm:$0xf]  ;;  %v1434_v25 = vld [vmem:[#allocation5 + $0x14] sm:$0xf0]  ;;  %v1170_v28 = vor.u32 %v1433_v20, %v1169_v19 }
  0x4c   : > { %523 = vmatpush.bf16.msra.mxu2 %v1226_v58  ;;  %536 = vmatpush.bf16.msra.mxu3 %v1230_v62  ;;  %v1432_v26 = vld [vmem:[#allocation5 + $0xc] sm:$0xf]  ;;  %v1179_v27 = vld [vmem:[#allocation5 + $0x18] sm:$0xf0]  ;;  %v1174_v29 = vor.u32 %v1431_v21, %v1171_v23  ;;  %v1178_v30 = vor.u32 %v1434_v25, %v1177_v24  ;;  %v323_v33 = vld [vmem:[#allocation7] sm:$0xf] }
  0x4d   : > { %v1182_v31 = vor.u32 %v1432_v26, %v1179_v27  ;;  %v290_v32 = vld [vmem:[%s1929_s28] sm:$0xf]  ;;  %v325_v34 = vperm.slane %v323_v33, 0  ;;  %v326_v35 = vperm.slane %v323_v33, 1  ;;  %v327_v42 = vperm.slane %v323_v33, 2  ;;  %v1468_v9 = vld [vmem:[#allocation8 + $0x28] sm:$0xff] }
  0x4e   : > { %498 = vmatpush.bf16.msra.mxu0 %v1202_v4  ;;  %v1470_v43 = vld [vmem:[#allocation8 + $0x38] sm:$0xff]  ;;  %v328_v46 = vperm.slane %v323_v33, 3  ;;  %v1469_v54 = vld [vmem:[#allocation8 + $0x30] sm:$0xff]  ;;  %v1467_v23 = vld [vmem:[#allocation8 + $0x20] sm:$0xff]  ;;  %s1166_s14 = sshll.u32 %s1925_s7, 3  ;;  %s1428_s16 = sshll.u32 %s1842_s25, 3 }
  0x4f   : > { %511 = vmatpush.bf16.msra.mxu1 %v1206_v5  ;;  %v1478_v44 = vld [vmem:[#allocation8 + $0x78] sm:$0xff]  ;;  %v1477_v55 = vld [vmem:[#allocation8 + $0x70] sm:$0xff]  ;;  %v1475_v24 = vld [vmem:[#allocation8 + $0x60] sm:$0xff]  ;;  %s1049_s23 = scalar_lea.hbm %s2092_s5, %s1428_s16  ;;  %s289_s27 = scalar_lea.vmem [#allocation10], %s1166_s14 }
  0x50   : > { %524 = vmatpush.bf16.msra.mxu2 %v1210_v6  ;;  %537 = vmatpush.bf16.msra.mxu3 %v1214_v10  ;;  %v1486_v62 = vld [vmem:[#allocation8 + $0xb8] sm:$0xff]  ;;  %v1476_v10 = vld [vmem:[#allocation8 + $0x68] sm:$0xff]  ;;  %v1485_v13 = vld [vmem:[#allocation8 + $0xb0] sm:$0xff]  ;;  %s1051_s10 = sshll.u32 %s289_s27, 4  ;;  %s1053_s9 = sshll.u32 %s1049_s23, 4  ;;  %s1052_s10 = int_to_ptr.vmem [resolvable:$true] %s1051_s10  ;;  %s1054_s9 = int_to_ptr.hbm [resolvable:$true] %s1053_s9 }
  0x51   : > { %v1494_v4 = vld [vmem:[#allocation8 + $0xf8] sm:$0xff]  ;;  %v1493_v14 = vld [vmem:[#allocation8 + $0xf0] sm:$0xff]  ;;  %v1492_v33 = vld [vmem:[#allocation8 + $0xe8] sm:$0xff]  ;;  %s1039_s11 = scalar_lea.sflag [#allocation4], %s1925_s7  ;;  %s1719_s12 = sshra.s32 %s1054_s9, 4  ;;  %s1720_s12 = int_to_ptr.hbm [resolvable:$true] %s1719_s12 }
  0x52   : > { %499 = vmatpush.bf16.msra.mxu0 %v1186_v16  ;;  %s1721_s25 = scalar_lea.hbm %s1720_s12, 8  ;;  %s1725_s28 = scalar_lea.hbm %s2092_s5, 16 }
  0x53   : > { %512 = vmatpush.bf16.msra.mxu1 %v1190_v17  ;;  %p1722_p1 = scmp.ne.s32.totalorder %s1720_s12, %s1721_s25  ;;  %p1726_p12 = scmp.lt.s32.totalorder %s1720_s12, %s2092_s5 }
  0x54   : > { %525 = vmatpush.bf16.msra.mxu2 %v1194_v18  ;;  %538 = vmatpush.bf16.msra.mxu3 %v1198_v22  ;;  %p1727_p8 = scmp.lt.s32.totalorder %s1725_s28, %s1721_s25 }
  0x55   : > { %p1723_p3 = pnand %p1722_p1, %p1894_p13 }
  0x56   : > { %500 = vmatpush.bf16.msra.mxu0 %v1170_v28  ;;  %p1728_p7 = por %p1727_p8, %p1726_p12 }
  0x57   : > { %513 = vmatpush.bf16.msra.mxu1 %v1174_v29  ;;  %p1724_p5 = pneg %p1723_p3 }
  0x58   : > { %526 = vmatpush.bf16.msra.mxu2 %v1178_v30  ;;  %539 = vmatpush.bf16.msra.mxu3 %v1182_v31 }
  0x59   : > { %501 = vmatmul.bf16.vlgmr.msra.gmra.mxu0 %v290_v32  ;;  %p1729_p9 = pnand %p1728_p7, %p1724_p5 }
  0x5a   : > { %514 = vmatmul.bf16.vlgmr.msra.gmra.mxu1 %v290_v32  ;;  %985 = vmatpush.bf16.msrb.mxu0 %v1470_v43 }
  0x5b   : > { %527 = vmatmul.bf16.vlgmr.msra.gmra.mxu2 %v290_v32  ;;  %540 = vmatmul.bf16.vlgmr.msra.gmra.mxu3 %v290_v32  ;;  %v1484_v32 = vld [vmem:[#allocation8 + $0xa8] sm:$0xff] }
  0x5c   : > { %998 = vmatpush.bf16.msrb.mxu1 %v1478_v44  ;;  %1011 = vmatpush.bf16.msrb.mxu2 %v1486_v62 }
  0x5d   : > { %1024 = vmatpush.bf16.msrb.mxu3 %v1494_v4  ;;  %v1473_v4 = vld [vmem:[#allocation8 + $0x50] sm:$0xff] }
  0x5e   : > { %986 = vmatpush.bf16.msrb.mxu0 %v1469_v54 }
  0x60   : > { %999 = vmatpush.bf16.msrb.mxu1 %v1477_v55  ;;  %1012 = vmatpush.bf16.msrb.mxu2 %v1485_v13 }
  0x61   : > { %1025 = vmatpush.bf16.msrb.mxu3 %v1493_v14 }
  0x62   : > { %987 = vmatpush.bf16.msrb.mxu0 %v1468_v9 }
  0x64   : > { %1000 = vmatpush.bf16.msrb.mxu1 %v1476_v10  ;;  %1013 = vmatpush.bf16.msrb.mxu2 %v1484_v32  ;;  %v1482_v10 = vld [vmem:[#allocation8 + $0x98] sm:$0xff]  ;;  %v1480_v32 = vld [vmem:[#allocation8 + $0x88] sm:$0xff] }
  0x65   : > { %1026 = vmatpush.bf16.msrb.mxu3 %v1492_v33 }
  0x66   : > { %988 = vmatpush.bf16.msrb.mxu0 %v1467_v23  ;;  %v1481_v23 = vld [vmem:[#allocation8 + $0x90] sm:$0xff] }
  0x68   : > { %1001 = vmatpush.bf16.msrb.mxu1 %v1475_v24  ;;  %v1489_v24 = vld [vmem:[#allocation8 + $0xd0] sm:$0xff] }
  0xd6   : > { %v502_v36 = vpop.f32.mrf.mxu0 }
  0xd7   : > { %v1944_v37 = vadd.f32 %v502_v36, %v325_v34  ;;  %v515_v38 = vpop.f32.mrf.mxu1 }
  0xd8   : > { %v1946_v39 = vadd.f32 %v515_v38, %v326_v35 }
  0xd9   : > { %v1949_v40 = vmul.f32 0.70710677, %v1944_v37 }
  0xda   : > { %v1952_v41 = vmul.f32 0.70710677, %v1946_v39 }
  0xdb   : > { %v553_v45 = vmul.f32 %v1949_v40, %v1949_v40 }
  0xdc   : > { %v593_v47 = vmul.f32 %v1952_v41, %v1952_v41 }
  0xdd   : > { %v1958_v48 = vmin.f32 %v553_v45, 16.0 }
  0xde   : > { %v528_v49 = vpop.f32.mrf.mxu2  ;;  %v1960_v50 = vmin.f32 %v593_v47, 16.0  ;;  %v541_v52 = vpop.f32.mrf.mxu3  ;;  %v1466_v47 = vld [vmem:[#allocation8 + $0x18] sm:$0xff] }
  0xdf   : > { %v1962_v51 = vadd.f32 %v528_v49, %v327_v42  ;;  %v504_v53 = vpop.f32.mrf.mxu0  ;;  %v555_v56 = vmul.f32 2.1237322e-06, %v1958_v48  ;;  %v566_v57 = vmul.f32 3.8918573e-05, %v1958_v48  ;;  %v1966_v58 = vadd.f32 %v541_v52, %v328_v46  ;;  %v517_v59 = vpop.f32.mrf.mxu1  ;;  %v1474_v49 = vld [vmem:[#allocation8 + $0x58] sm:$0xff]  ;;  %989 = vmatpush.bf16.msrb.mxu0 %v1466_v47 }
  0xe0   : > { %v595_v60 = vmul.f32 2.1237322e-06, %v1960_v50  ;;  %v606_v61 = vmul.f32 3.8918573e-05, %v1960_v50  ;;  %1002 = vmatpush.bf16.msrb.mxu1 %v1474_v49 }
  0xe1   : > { %v556_v63 = vadd.f32 0.00028619796, %v555_v56  ;;  %v567_v0 = vadd.f32 0.001143296, %v566_v57  ;;  %v1971_v1 = vmul.f32 0.70710677, %v1962_v51 }
  0xe2   : > { %v596_v2 = vadd.f32 0.00028619796, %v595_v60  ;;  %v607_v3 = vadd.f32 0.001143296, %v606_v61  ;;  %v1978_v8 = vmul.f32 0.70710677, %v1966_v58 }
  0xe3   : > { %v557_v5 = vmul.f32 %v556_v63, %v1958_v48  ;;  %v568_v6 = vmul.f32 %v567_v0, %v1958_v48  ;;  %v633_v7 = vmul.f32 %v1971_v1, %v1971_v1  ;;  %v1483_v56 = vld [vmem:[#allocation8 + $0xa0] sm:$0xff] }
  0xe4   : > { %v597_v11 = vmul.f32 %v596_v2, %v1960_v50  ;;  %v608_v12 = vmul.f32 %v607_v3, %v1960_v50  ;;  %v673_v18 = vmul.f32 %v1978_v8, %v1978_v8  ;;  %v1491_v57 = vld [vmem:[#allocation8 + $0xe0] sm:$0xff]  ;;  %1014 = vmatpush.bf16.msrb.mxu2 %v1483_v56  ;;  %v1465_v3 = vld [vmem:[#allocation8 + $0x10] sm:$0xff]  ;;  %1003 = vmatpush.bf16.msrb.mxu1 %v1473_v4 }
  0xe5   : > { %v558_v15 = vadd.f32 0.0036580483, %v557_v5  ;;  %v569_v16 = vadd.f32 0.014752088, %v568_v6  ;;  %v1982_v17 = vmin.f32 %v633_v7, 16.0  ;;  %1027 = vmatpush.bf16.msrb.mxu3 %v1491_v57  ;;  %990 = vmatpush.bf16.msrb.mxu0 %v1465_v3  ;;  %v1487_v57 = vld [vmem:[#allocation8 + $0xc0] sm:$0xff] }
  0xe6   : > { %v530_v19 = vpop.f32.mrf.mxu2  ;;  %v598_v20 = vadd.f32 0.0036580483, %v597_v11  ;;  %v609_v21 = vadd.f32 0.014752088, %v608_v12  ;;  %v543_v22 = vpop.f32.mrf.mxu3  ;;  %v1992_v31 = vmin.f32 %v673_v18, 16.0  ;;  %v1490_v11 = vld [vmem:[#allocation8 + $0xd8] sm:$0xff] }
  0xe7   : > { %v559_v25 = vmul.f32 %v558_v15, %v1958_v48  ;;  %v570_v26 = vmul.f32 %v569_v16, %v1958_v48  ;;  %v635_v27 = vmul.f32 2.1237322e-06, %v1982_v17  ;;  %v646_v28 = vmul.f32 3.8918573e-05, %v1982_v17  ;;  %v1464_v18 = vld [vmem:[#allocation8 + $0x8] sm:$0xff] }
  0xe8   : > { %v599_v29 = vmul.f32 %v598_v20, %v1960_v50  ;;  %v610_v30 = vmul.f32 %v609_v21, %v1960_v50  ;;  %v675_v54 = vmul.f32 2.1237322e-06, %v1992_v31  ;;  %v686_v55 = vmul.f32 3.8918573e-05, %v1992_v31  ;;  %1015 = vmatpush.bf16.msrb.mxu2 %v1482_v10  ;;  %v1472_v21 = vld [vmem:[#allocation8 + $0x48] sm:$0xff] }
  0xe9   : > { %v560_v34 = vadd.f32 0.05243302, %v559_v25  ;;  %v571_v35 = vadd.f32 0.112945676, %v570_v26  ;;  %v636_v36 = vadd.f32 0.00028619796, %v635_v27  ;;  %1028 = vmatpush.bf16.msrb.mxu3 %v1490_v11  ;;  %991 = vmatpush.bf16.msrb.mxu0 %v1464_v18 }
  0xea   : > { %v600_v38 = vadd.f32 0.05243302, %v599_v29  ;;  %v611_v42 = vadd.f32 0.112945676, %v610_v30  ;;  %v647_v43 = vadd.f32 0.001143296, %v646_v28  ;;  %1004 = vmatpush.bf16.msrb.mxu1 %v1472_v21 }
  0xeb   : > { %v561_v44 = vmul.f32 %v560_v34, %v1958_v48  ;;  %v572_v45 = vmul.f32 %v571_v35, %v1958_v48  ;;  %v637_v46 = vmul.f32 %v636_v36, %v1982_v17  ;;  %v676_v7 = vadd.f32 0.00028619796, %v675_v54  ;;  %v1471_v30 = vld [vmem:[#allocation8 + $0x40] sm:$0xff]  ;;  %v1488_v36 = vld [vmem:[#allocation8 + $0xc8] sm:$0xff] }
  0xec   : > { %v612_v52 = vmul.f32 %v611_v42, %v1960_v50  ;;  %v648_v53 = vmul.f32 %v647_v43, %v1982_v17  ;;  %v601_v60 = vmul.f32 %v600_v38, %v1960_v50  ;;  %v687_v9 = vadd.f32 0.001143296, %v686_v55  ;;  %1016 = vmatpush.bf16.msrb.mxu2 %v1481_v23 }
  0xed   : > { %v573_v59 = vadd.f32 0.4994258, %v572_v45  ;;  %v562_v63 = vadd.f32 0.18741608, %v561_v44  ;;  %v638_v2 = vadd.f32 0.0036580483, %v637_v46  ;;  %v677_v22 = vmul.f32 %v676_v7, %v1992_v31  ;;  %1029 = vmatpush.bf16.msrb.mxu3 %v1489_v24 }
  0xee   : > { %v613_v61 = vadd.f32 0.4994258, %v612_v52  ;;  %v649_v62 = vadd.f32 0.014752088, %v648_v53  ;;  %v602_v13 = vadd.f32 0.18741608, %v601_v60  ;;  %v688_v16 = vmul.f32 %v687_v9, %v1992_v31  ;;  %1005 = vmatpush.bf16.msrb.mxu1 %v1471_v30 }
  0xef   : > { %v574_v0 = vmul.f32 %v573_v59, %v1958_v48  ;;  %v563_v19 = vmul.f32 %v562_v63, %v1958_v48  ;;  %v639_v20 = vmul.f32 %v638_v2, %v1982_v17  ;;  %v1463_v48 = vld [vmem:[#allocation8] sm:$0xff]  ;;  %v678_v34 = vadd.f32 0.0036580483, %v677_v22 }
  0xf0   : > { %v614_v5 = vmul.f32 %v613_v61, %v1960_v50  ;;  %v650_v6 = vmul.f32 %v649_v62, %v1982_v17  ;;  %v603_v25 = vmul.f32 %v602_v13, %v1960_v50  ;;  %v689_v27 = vadd.f32 0.014752088, %v688_v16  ;;  %992 = vmatpush.bf16.msrb.mxu0 %v1463_v48  ;;  %1017 = vmatpush.bf16.msrb.mxu2 %v1480_v32  ;;  %v1479_v45 = vld [vmem:[#allocation8 + $0x80] sm:$0xff] }
  0xf1   : > { %v2005_v12 = vadd.f32 1.0, %v574_v0  ;;  %v564_v28 = vadd.f32 1.1283791, %v563_v19  ;;  %v640_v29 = vadd.f32 0.05243302, %v639_v20  ;;  %v679_v56 = vmul.f32 %v678_v34, %v1992_v31  ;;  %1030 = vmatpush.bf16.msrb.mxu3 %v1488_v36 }
  0xf2   : > { %v2007_v14 = vadd.f32 1.0, %v614_v5  ;;  %v651_v15 = vadd.f32 0.112945676, %v650_v6  ;;  %v690_v35 = vmul.f32 %v689_v27, %v1992_v31  ;;  %v604_v43 = vadd.f32 1.1283791, %v603_v25 }
  0xf3   : > { %1577 = vrcp.f32 %v2005_v12  ;;  %v565_v46 = vmul.f32 %v564_v28, %v1949_v40  ;;  %v641_v49 = vmul.f32 %v640_v29, %v1982_v17  ;;  %v585_v54 = vand.u32 2147483647, %v2005_v12 }
  0xf4   : > { %1579 = vrcp.f32 %v2007_v14  ;;  %v652_v26 = vmul.f32 %v651_v15, %v1982_v17  ;;  %v691_v52 = vadd.f32 0.112945676, %v690_v35  ;;  %v587_v59 = vand.u32 2147483648, %v2005_v12  ;;  %1018 = vmatpush.bf16.msrb.mxu2 %v1479_v45 }
  0xf5   : > { %v625_v61 = vand.u32 2147483647, %v2007_v14  ;;  %v627_v63 = vand.u32 2147483648, %v2007_v14  ;;  %v642_v2 = vadd.f32 0.18741608, %v641_v49  ;;  %vm581_vm2 = vweird.f32 %v2005_v12  ;;  %1031 = vmatpush.bf16.msrb.mxu3 %v1487_v57 }
  0xf6   : > { %v653_v33 = vadd.f32 0.4994258, %v652_v26  ;;  %v692_v40 = vmul.f32 %v691_v52, %v1992_v31  ;;  %v605_v5 = vmul.f32 %v604_v43, %v1952_v41  ;;  %v680_v6 = vadd.f32 0.05243302, %v679_v56 }
  0xf7   : > { %v588_v7 = vor.u32 1.1754944e-38, %v587_v59  ;;  %vm621_vm4 = vweird.f32 %v2007_v14  ;;  %vm586_vm5 = vcmp.eq.f32.partialorder %v585_v54, 8.507059e+37  ;;  %vm626_vm7 = vcmp.eq.f32.partialorder %v625_v61, 8.507059e+37 }
  0xf8   : > { %v654_v44 = vmul.f32 %v653_v33, %v1982_v17  ;;  %v693_v3 = vadd.f32 0.4994258, %v692_v40  ;;  %v628_v13 = vor.u32 1.1754944e-38, %v627_v63  ;;  %v681_v21 = vmul.f32 %v680_v6, %v1992_v31 }
  0xf9   : > { %v1578_v38 = vpop.eup %1577  ;;  %v545_v23 = vmul.f32 0.5, %v1944_v37  ;;  %v546_v48 = vmul.f32 0.5, %v1946_v39  ;;  %v547_v56 = vmul.f32 0.5, %v1962_v51 }
  0xfa   : > { %v1580_v42 = vpop.eup %1579  ;;  %v577_v50 = vmul.f32 %v1578_v38, %v2005_v12  ;;  %v2024_v55 = vadd.f32 1.0, %v654_v44  ;;  %vm582_vm0 = vweird.f32 %v1578_v38  ;;  %v694_v10 = vmul.f32 %v693_v3, %v1992_v31 }
  0xfb   : > { %v617_v47 = vmul.f32 %v1580_v42, %v2007_v14  ;;  %vm622_vm1 = vweird.f32 %v1580_v42  ;;  %vm583_vm3 = vmor %vm581_vm2, %vm582_vm0  ;;  %v643_v12 = vmul.f32 %v642_v2, %v1982_v17  ;;  %v682_v29 = vadd.f32 0.18741608, %v681_v21 }
  0xfc   : > { %v578_v53 = vsub.f32 1.0, %v577_v50  ;;  %1581 = vrcp.f32 %v2024_v55  ;;  %vm623_vm6 = vmor %vm621_vm4, %vm622_vm1  ;;  %v695_v41 = vadd.f32 1.0, %v694_v10  ;;  %v665_v17 = vand.u32 2147483647, %v2024_v55  ;;  %v1576_v10 = vld [vmem:[%s2091_s4] ss:$0 sm:$0xff] }
  0xfd   : > { %v618_v60 = vsub.f32 1.0, %v617_v47  ;;  %v644_v24 = vadd.f32 1.1283791, %v643_v12  ;;  %v667_v28 = vand.u32 2147483648, %v2024_v55  ;;  %vm661_vm9 = vweird.f32 %v2024_v55 }
  0xfe   : > { %v579_v62 = vmul.f32 %v1578_v38, %v578_v53  ;;  %1583 = vrcp.f32 %v695_v41  ;;  %v683_v39 = vmul.f32 %v682_v29, %v1992_v31  ;;  %vm666_vm11 = vcmp.eq.f32.partialorder %v665_v17, 8.507059e+37 }
  0xff   : > { %v619_v0 = vmul.f32 %v1580_v42, %v618_v60  ;;  %v707_v53 = vand.u32 2147483648, %v695_v41  ;;  %vm701_vm13 = vweird.f32 %v695_v41  ;;  %v548_v3 = vmul.f32 0.5, %v1966_v58 }
 0x100   : > { %v580_v4 = vadd.f32 %v1578_v38, %v579_v62  ;;  %v684_v52 = vadd.f32 1.1283791, %v683_v39 }
 0x101   : > { %v620_v9 = vadd.f32 %v1580_v42, %v619_v0  ;;  %v708_v59 = vor.u32 1.1754944e-38, %v707_v53 }
 0x102   : > { %v584_v11 = vsel %vm583_vm3, %v1578_v38, %v580_v4  ;;  %v1582_v18 = vpop.eup %1581  ;;  %v645_v38 = vmul.f32 %v644_v24, %v1971_v1  ;;  %v685_v60 = vmul.f32 %v684_v52, %v1978_v8 }
 0x103   : > { %v589_v15 = vsel %vm586_vm5, %v588_v7, %v584_v11  ;;  %v624_v16 = vsel %vm623_vm6, %v1580_v42, %v620_v9  ;;  %v657_v14 = vmul.f32 %v1582_v18, %v2024_v55  ;;  %vm662_vm8 = vweird.f32 %v1582_v18 }
 0x104   : > { %v590_v19 = vmul.f32 %v589_v15, %v565_v46  ;;  %v629_v20 = vsel %vm626_vm7, %v628_v13, %v624_v16  ;;  %v1584_v36 = vpop.eup %1583  ;;  %vm663_vm10 = vmor %vm661_vm9, %vm662_vm8  ;;  %v668_v42 = vor.u32 1.1754944e-38, %v667_v28  ;;  %v705_v55 = vand.u32 2147483647, %v695_v41 }
 0x105   : > { %v630_v22 = vmul.f32 %v629_v20, %v605_v5  ;;  %v658_v25 = vsub.f32 1.0, %v657_v14  ;;  %v697_v43 = vmul.f32 %v1584_v36, %v695_v41  ;;  %vm702_vm12 = vweird.f32 %v1584_v36 }
 0x106   : > { %v1295_v26 = vclamps-f32 %v590_v19, 1.0  ;;  %vm703_vm14 = vmor %vm701_vm13, %vm702_vm12  ;;  %vm706_vm15 = vcmp.eq.f32.partialorder %v705_v55, 8.507059e+37 }
 0x107   : > { %v1296_v27 = vclamps-f32 %v630_v22, 1.0  ;;  %v659_v30 = vmul.f32 %v1582_v18, %v658_v25  ;;  %v698_v49 = vsub.f32 1.0, %v697_v43 }
 0x108   : > { %v713_v32 = vadd.f32 1.0, %v1295_v26 }
 0x109   : > { %v714_v33 = vadd.f32 1.0, %v1296_v27  ;;  %v660_v34 = vadd.f32 %v1582_v18, %v659_v30  ;;  %v699_v54 = vmul.f32 %v1584_v36, %v698_v49 }
 0x10a   : > { %v717_v37 = vmul.f32 %v713_v32, %v545_v23 }
 0x10b   : > { %v718_v35 = vmul.f32 %v714_v33, %v546_v48  ;;  %v664_v50 = vsel %vm663_vm10, %v1582_v18, %v660_v34  ;;  %v700_v57 = vadd.f32 %v1584_v36, %v699_v54 }
 0x10c   : > { %v721_v44 = vpack.c.bf16 %v717_v37, %v717_v37  ;;  %v669_v45 = vsel %vm666_vm11, %v668_v42, %v664_v50 }
 0x10d   : > { %v722_v46 = vpack.c.bf16 %v718_v35, %v718_v35  ;;  %v670_v47 = vmul.f32 %v669_v45, %v645_v38  ;;  %v704_v61 = vsel %vm703_vm14, %v1584_v36, %v700_v57 }
 0x10e   : > { %993 = vmatmul.bf16.vlgmr.msrb.gmra.mxu0 %v721_v44  ;;  %v709_v62 = vsel %vm706_vm15, %v708_v59, %v704_v61 }
 0x10f   : > { %1006 = vmatmul.bf16.vlgmr.msrb.gmra.mxu1 %v722_v46  ;;  %v1297_v1 = vclamps-f32 %v670_v47, 1.0  ;;  %v710_v63 = vmul.f32 %v709_v62, %v685_v60 }
 0x111   : > { %v715_v31 = vadd.f32 1.0, %v1297_v1  ;;  %v1298_v2 = vclamps-f32 %v710_v63, 1.0 }
 0x113   : > { %v719_v40 = vmul.f32 %v715_v31, %v547_v56  ;;  %v716_v51 = vadd.f32 1.0, %v1298_v2 }
 0x115   : > { %v723_v0 = vpack.c.bf16 %v719_v40, %v719_v40  ;;  %v720_v4 = vmul.f32 %v716_v51, %v548_v3 }
 0x117   : > { %1019 = vmatmul.bf16.vlgmr.msrb.gmra.mxu2 %v723_v0  ;;  %v724_v5 = vpack.c.bf16 %v720_v4, %v720_v4 }
 0x119   : > { %1032 = vmatmul.bf16.vlgmr.msrb.gmra.mxu3 %v724_v5 }
 0x18b   : > { %v994_v6 = vpop.f32.mrf.mxu0 }
 0x18c   : > { %v1007_v7 = vpop.f32.mrf.mxu1  ;;  %v995_v11 = vadd.f32 %v1576_v10, %v994_v6 }
 0x18e   : > { %v1008_v15 = vadd.f32 %v1007_v7, %v995_v11 }
 0x193   : > { %v996_v9 = vpop.f32.mrf.mxu0 }
 0x194   : > { %v1009_v8 = vpop.f32.mrf.mxu1 }
 0x19a   : > { %v1020_v13 = vpop.f32.mrf.mxu2 }
 0x19b   : > { %v1021_v58 = vadd.f32 %v1020_v13, %v1008_v15 }
 0x19c   : > { %v1033_v16 = vpop.f32.mrf.mxu3 }
 0x19d   : > { %v1034_v41 = vadd.f32 %v1033_v16, %v1021_v58 }
 0x19f   : > { %1037 = vst [vmem:[%s289_s27] sm:$0xff] %v1034_v41 }
 0x1a2   : > { %v1022_v12 = vpop.f32.mrf.mxu2 }
 0x1a3   : > { %1732 = shalt.err (!%p1729_p9)
}
 0x1a4   : > { %1509 = dma.vmem_to_hbm [thread:$0]  (%p1894_p13), %s1052_s10, 128, %s1054_s9, %s1039_s11   ;;  %v1035_v18 = vpop.f32.mrf.mxu3 }
 0x1a5 PF: > { %s1065_s7 = sand.u32 1, %s1767_s18   ;;  %p2099_p10 = scmp.ge.s32.totalorder %s1779_s21, 2 }
 0x1a6   : > { %s1066_s14 = scalar_lea.sflag [#allocation4], %s1065_s7 }
 0x1a7   : > { %p1526_p11 = pnand %p2099_p10, %p1899_p4 }
 0x1a9   : > { %p1527_p0 = pneg %p1526_p11 }
 0x1ab   : > { %1762 = dma.done.wait (%p1527_p0), %s1066_s14, 128  }
 0x1ac   : > { %1764 = vsyncadd (%p1527_p0), %s1066_s14, 4294967168  ;;  %p20_p2 = scmp.ge.s32.totalorder %s1874_s24, 4   ;;  %s2100_s18 = smov %s1771_s19 }
 0x1ad   : > { %s2101_s19 = smov %s1775_s20  ;;  %s2102_s20 = smov %s1886_s29 }
 0x1ae   : > { %s2103_s21 = smov %s1874_s24  ;;  %22 = sbr.rel (!%p20_p2) target bundleno = 7 (0x7), region = 97 }
 0x1b3   :  { %1072 = vsyncpa [#allocation3], 1 }
 0x1b4   :  { %1074 = vsyncpa [#allocation3 + $0x1], 1 }
 0x1b5   :  { %1075 = vsyncpa [#allocation6], 1 }
 0x1b6   :  { %1076 = vsyncpa [#allocation9], 1 }
 0x1b7   :  { %1077 = vsyncpa [#allocation4], 1 }
 0x1b8   :  { %1079 = vsyncpa [#allocation4 + $0x1], 1 }

</bundles_post_ra>
